<compile_context>
chip_gen: v5e
topology: v5e:2x2
jax: 0.10.0
libtpu: 0.0.40
codegen_flags: <defaults>
</compile_context>

<pallas_src>
import functools
import math

import jax
import jax.numpy as jnp
import numpy as np
from jax.experimental import pallas as pl
from jax.experimental.pallas import tpu as pltpu

_LOG_2PI = math.log(2.0 * math.pi)


def _round_up(x, m):
    return ((x + m - 1) // m) * m


def _choose_row_tile(o_pad, i_pad, budget_bytes=20 * 1024 * 1024, resident_bufs=10):
    """Largest multiple-of-8 divisor of o_pad whose (TO, i_pad) f32 buffers fit the budget."""
    max_to = budget_bytes // (resident_bufs * i_pad * 4)
    max_to = max(8, (max_to // 8) * 8)
    if o_pad <= max_to:
        return o_pad
    to = (min(o_pad, max_to) // 8) * 8
    while to > 8 and o_pad % to != 0:
        to -= 8
    return max(8, to)


def _factorised_param_kernel(mean_ref, lvs_ref, eps_ref, w_ref, partial_ref,
                             mu_ref, sigma_ref, *, log_var_lr, in_features):
    """Grid = (out_features tile j, sample s). One step = one (tile, sample) pair."""
    sqrt_prec = 1.0 / math.sqrt(in_features)

    # mu / sigma depend only on the out-features tile (grid axis 0): compute them once
    # per tile (first sample) into VMEM scratch and reuse them for all S samples.
    @pl.when(pl.program_id(1) == 0)
    def _():
        mu_ref[...] = sqrt_prec * mean_ref[...]
        sigma_ref[...] = sqrt_prec * jnp.exp((0.5 * log_var_lr) * lvs_ref[...])

    eps = eps_ref[0]                                   # (TO, I_pad)
    w = mu_ref[...] + sigma_ref[...] * eps             # reparameterised sample
    w_ref[0] = w.astype(w_ref.dtype)

    # Per-tile contribution to logpq[s]; (w - mu)/sigma == eps exactly, and the
    # log(2pi)/log(I)/log(sigma) constants are folded into the wrapper-side constant.
    sum_w2 = jnp.sum(w * w)
    sum_e2 = jnp.sum(eps * eps)
    val = (-0.5 * float(in_features)) * sum_w2 + 0.5 * sum_e2
    # Lane-dense scalar broadcast (unmasked 1x128 store), cheapest robust writeback.
    partial_ref[...] = jnp.full((1, 1, 1, 128), val, dtype=partial_ref.dtype)


def factorised_param_forward(Xi, post_mean, post_log_var_scaled, eps, *, log_var_lr=1.0):
    """Returns (w, logpq): w (S, out_features, in_features), logpq (S,)."""
    S = Xi.shape[0]
    O, I = post_mean.shape
    assert eps.shape == (S, O, I)

    f32 = jnp.float32
    O_pad = _round_up(O, 8)
    I_pad = _round_up(I, 128)
    TO = _choose_row_tile(O_pad, I_pad)
    J = O_pad // TO

    mean_p = post_mean.astype(f32)
    lvs_p = post_log_var_scaled.astype(f32)
    eps_p = eps.astype(f32)
    if (O_pad, I_pad) != (O, I):
        # Zero padding: padded rows/cols give w == 0 and contribute 0 to both sums.
        mean_p = jnp.zeros((O_pad, I_pad), f32).at[:O, :I].set(mean_p)
        lvs_p = jnp.zeros((O_pad, I_pad), f32).at[:O, :I].set(lvs_p)
        eps_p = jnp.zeros((S, O_pad, I_pad), f32).at[:, :O, :I].set(eps_p)

    kernel = functools.partial(_factorised_param_kernel,
                               log_var_lr=float(log_var_lr), in_features=I)

    w_pad, partial = pl.pallas_call(
        kernel,
        out_shape=(
            jax.ShapeDtypeStruct((S, O_pad, I_pad), f32),
            jax.ShapeDtypeStruct((J, S, 1, 128), f32),
        ),
        grid=(J, S),
        in_specs=[
            pl.BlockSpec((TO, I_pad), lambda j, s: (j, 0)),        # post_mean tile
            pl.BlockSpec((TO, I_pad), lambda j, s: (j, 0)),        # post_log_var_scaled tile
            pl.BlockSpec((1, TO, I_pad), lambda j, s: (s, j, 0)),  # eps tile for sample s
        ],
        out_specs=(
            pl.BlockSpec((1, TO, I_pad), lambda j, s: (s, j, 0)),      # w tile
            pl.BlockSpec((1, 1, 1, 128), lambda j, s: (j, s, 0, 0)),   # partial logpq
        ),
        scratch_shapes=[
            pltpu.VMEM((TO, I_pad), f32),   # mu (cached per out-tile)
            pltpu.VMEM((TO, I_pad), f32),   # sigma (cached per out-tile)
        ],
        compiler_params=pltpu.CompilerParams(
            dimension_semantics=("parallel", "arbitrary"),
            vmem_limit_bytes=32 * 1024 * 1024,
        ),
    )(mean_p, lvs_p, eps_p)

    # Sample-independent constant: sum(log sigma) + 0.5*n*log(I) = 0.5*log_var_lr*sum(lvs).
    const = 0.5 * float(log_var_lr) * jnp.sum(post_log_var_scaled.astype(f32))
    logpq = jnp.sum(partial[:, :, 0, 0], axis=0) + const

    w = w_pad[:, :O, :I] if (O_pad, I_pad) != (O, I) else w_pad
    return w, logpq


def _reference(post_mean, post_log_var_scaled, eps, log_var_lr):
    """Pure-JAX reference mirroring the PyTorch forward (unsimplified algebra)."""
    O, I = post_mean.shape
    n_elem = O * I
    sqrt_prec = 1.0 / math.sqrt(I)
    post_log_var = post_log_var_scaled * log_var_lr
    mu = sqrt_prec * post_mean
    sigma = sqrt_prec * jnp.exp(0.5 * post_log_var)
    w = mu + sigma * eps                                           # (S, O, I)
    logP = (-0.5 * I * jnp.sum(w * w, axis=(-1, -2))
            + 0.5 * n_elem * math.log(float(I))
            - 0.5 * n_elem * _LOG_2PI)
    logQ = jnp.sum(-0.5 * ((w - mu) / sigma) ** 2 - jnp.log(sigma) - 0.5 * _LOG_2PI,
                   axis=(-1, -2))
    return w, logP - logQ


if __name__ == "__main__":
    # Small shapes: in_shape = (128,) -> in_features = 128; out_features = 16; S = 4 samples.
    S, batch, in_features, out_features = 4, 2, 128, 16
    mean_init_mult, var_init_mult, log_var_lr = 1.0, 0.001, 1.0

    key = jax.random.PRNGKey(0)
    k_xi, k_mean, k_eps = jax.random.split(key, 3)

    # Xi is only used for its leading (sample) dimension S.
    Xi = jax.random.normal(k_xi, (S, batch, in_features), dtype=jnp.float32)

    # Deterministic parameter init (mirrors nn.Parameter shapes in __init__).
    post_mean = mean_init_mult * jax.random.normal(
        k_mean, (out_features, in_features), dtype=jnp.float32)
    post_log_var_scaled = (math.log(var_init_mult) / log_var_lr) * jnp.ones(
        (out_features, in_features), dtype=jnp.float32)

    # Gaussian noise for rsample drawn outside the kernel (see TODO(synk) at top).
    eps = jax.random.normal(k_eps, (S, out_features, in_features), dtype=jnp.float32)

    w, logpq = factorised_param_forward(
        Xi, post_mean, post_log_var_scaled, eps, log_var_lr=log_var_lr)
    jax.block_until_ready((w, logpq))

    assert w.shape == (S, out_features, in_features)
    assert logpq.shape == (S,)

    w_ref, logpq_ref = _reference(post_mean, post_log_var_scaled, eps, log_var_lr)
    np.testing.assert_allclose(np.asarray(w), np.asarray(w_ref), rtol=1e-5, atol=1e-5)
    np.testing.assert_allclose(np.asarray(logpq), np.asarray(logpq_ref), rtol=5e-3, atol=1e-1)

    print("KERNEL_OK")
</pallas_src>

<mosaic_0001>
module attributes {stable_mosaic.version = 11 : i64} {
  func.func @_factorised_param_kernel(%arg0: i32, %arg1: i32, %arg2: memref<16x128xf32, #tpu.memory_space<vmem>>, %arg3: memref<16x128xf32, #tpu.memory_space<vmem>>, %arg4: memref<1x16x128xf32, #tpu.memory_space<vmem>>, %arg5: memref<1x16x128xf32, #tpu.memory_space<vmem>>, %arg6: memref<1x1x1x128xf32, #tpu.memory_space<vmem>>, %arg7: memref<16x128xf32, #tpu.memory_space<vmem>>, %arg8: memref<16x128xf32, #tpu.memory_space<vmem>>) attributes {dimension_semantics = [#tpu.dimension_semantics<parallel>, #tpu.dimension_semantics<arbitrary>], iteration_bounds = array<i64: 1, 4>, scalar_prefetch = 0 : i64, scratch_operands = 2 : i64, tpu.core_type = #tpu.core_type<tc>, window_params = [{transform_indices = @transform_0, window_bounds = array<i64: 16, 128>}, {transform_indices = @transform_1, window_bounds = array<i64: 16, 128>}, {transform_indices = @transform_2, window_bounds = array<i64: 1, 16, 128>}, {transform_indices = @transform_3, window_bounds = array<i64: 1, 16, 128>}, {transform_indices = @transform_4, window_bounds = array<i64: 1, 1, 1, 128>}]} {
    %c0_i32 = arith.constant 0 : i32
    %0 = arith.cmpi eq, %arg1, %c0_i32 : i32
    %1 = arith.extui %0 : i1 to i32
    %c0_i32_0 = arith.constant 0 : i32
    %2 = arith.cmpi ne, %1, %c0_i32_0 : i32
    scf.if %2 {
      %c0_17 = arith.constant 0 : index
      %c0_18 = arith.constant 0 : index
      %27 = vector.load %arg2[%c0_17, %c0_18] : memref<16x128xf32, #tpu.memory_space<vmem>>, vector<16x128xf32>
      %cst_19 = arith.constant 0.0883883461 : f32
      %28 = vector.broadcast %cst_19 : f32 to vector<16x128xf32>
      %29 = arith.mulf %28, %27 : vector<16x128xf32>
      %c0_20 = arith.constant 0 : index
      %c0_21 = arith.constant 0 : index
      %30 = vector.load %arg7[%c0_20, %c0_21] : memref<16x128xf32, #tpu.memory_space<vmem>>, vector<16x128xf32>
      tpu.vector_store %arg7[%c0_20, %c0_21], %29 {strides = array<i32>} : memref<16x128xf32, #tpu.memory_space<vmem>>, vector<16x128xf32>,
      %c0_22 = arith.constant 0 : index
      %c0_23 = arith.constant 0 : index
      %31 = vector.load %arg3[%c0_22, %c0_23] : memref<16x128xf32, #tpu.memory_space<vmem>>, vector<16x128xf32>
      %cst_24 = arith.constant 5.000000e-01 : f32
      %32 = vector.broadcast %cst_24 : f32 to vector<16x128xf32>
      %33 = arith.mulf %32, %31 : vector<16x128xf32>
      %34 = math.exp %33 : vector<16x128xf32>
      %cst_25 = arith.constant 0.0883883461 : f32
      %35 = vector.broadcast %cst_25 : f32 to vector<16x128xf32>
      %36 = arith.mulf %35, %34 : vector<16x128xf32>
      %c0_26 = arith.constant 0 : index
      %c0_27 = arith.constant 0 : index
      %37 = vector.load %arg8[%c0_26, %c0_27] : memref<16x128xf32, #tpu.memory_space<vmem>>, vector<16x128xf32>
      tpu.vector_store %arg8[%c0_26, %c0_27], %36 {strides = array<i32>} : memref<16x128xf32, #tpu.memory_space<vmem>>, vector<16x128xf32>,
    } else {
    }
    %c0 = arith.constant 0 : index
    %c0_1 = arith.constant 0 : index
    %c0_2 = arith.constant 0 : index
    %3 = vector.load %arg4[%c0, %c0_1, %c0_2] : memref<1x16x128xf32, #tpu.memory_space<vmem>>, vector<1x16x128xf32>
    %4 = vector.shape_cast %3 : vector<1x16x128xf32> to vector<16x128xf32>
    %c0_3 = arith.constant 0 : index
    %c0_4 = arith.constant 0 : index
    %5 = vector.load %arg7[%c0_3, %c0_4] : memref<16x128xf32, #tpu.memory_space<vmem>>, vector<16x128xf32>
    %c0_5 = arith.constant 0 : index
    %c0_6 = arith.constant 0 : index
    %6 = vector.load %arg8[%c0_5, %c0_6] : memref<16x128xf32, #tpu.memory_space<vmem>>, vector<16x128xf32>
    %7 = arith.mulf %6, %4 : vector<16x128xf32>
    %8 = arith.addf %5, %7 : vector<16x128xf32>
    %c0_7 = arith.constant 0 : index
    %c0_8 = arith.constant 0 : index
    %c0_9 = arith.constant 0 : index
    %9 = vector.load %arg5[%c0_7, %c0_8, %c0_9] : memref<1x16x128xf32, #tpu.memory_space<vmem>>, vector<1x16x128xf32>
    %10 = vector.shape_cast %9 : vector<1x16x128xf32> to vector<16x128xf32>
    %11 = vector.shape_cast %8 : vector<16x128xf32> to vector<1x16x128xf32>
    tpu.vector_store %arg5[%c0_7, %c0_8, %c0_9], %11 {strides = array<i32>} : memref<1x16x128xf32, #tpu.memory_space<vmem>>, vector<1x16x128xf32>,
    %12 = arith.mulf %8, %8 : vector<16x128xf32>
    %13 = vector.shape_cast %12 : vector<16x128xf32> to vector<1x16x128xf32>
    %cst = arith.constant dense<0.000000e+00> : vector<1xf32>
    %14 = vector.multi_reduction <add>, %13, %cst [1, 2] : vector<1x16x128xf32> to vector<1xf32>
    %15 = vector.shape_cast %14 : vector<1xf32> to vector<1x1x1xf32>
    %16 = vector.extract %15[0, 0, 0] : f32 from vector<1x1x1xf32>
    %17 = arith.mulf %4, %4 : vector<16x128xf32>
    %18 = vector.shape_cast %17 : vector<16x128xf32> to vector<1x16x128xf32>
    %cst_10 = arith.constant dense<0.000000e+00> : vector<1xf32>
    %19 = vector.multi_reduction <add>, %18, %cst_10 [1, 2] : vector<1x16x128xf32> to vector<1xf32>
    %20 = vector.shape_cast %19 : vector<1xf32> to vector<1x1x1xf32>
    %21 = vector.extract %20[0, 0, 0] : f32 from vector<1x1x1xf32>
    %cst_11 = arith.constant -6.400000e+01 : f32
    %22 = arith.mulf %cst_11, %16 : f32
    %cst_12 = arith.constant 5.000000e-01 : f32
    %23 = arith.mulf %cst_12, %21 : f32
    %24 = arith.addf %22, %23 : f32
    %25 = vector.broadcast %24 : f32 to vector<1x1x1x128xf32>
    %c0_13 = arith.constant 0 : index
    %c0_14 = arith.constant 0 : index
    %c0_15 = arith.constant 0 : index
    %c0_16 = arith.constant 0 : index
    %26 = vector.load %arg6[%c0_13, %c0_14, %c0_15, %c0_16] : memref<1x1x1x128xf32, #tpu.memory_space<vmem>>, vector<1x1x1x128xf32>
    tpu.vector_store %arg6[%c0_13, %c0_14, %c0_15, %c0_16], %25 {strides = array<i32>} : memref<1x1x1x128xf32, #tpu.memory_space<vmem>>, vector<1x1x1x128xf32>,
    return
  }
  func.func @transform_0(%arg0: i32, %arg1: i32) -> (i32, i32) {
    %c0_i32 = arith.constant 0 : i32
    %c0_i32_0 = arith.constant 0 : i32
    return %arg0, %c0_i32 : i32, i32
  }
  func.func @transform_1(%arg0: i32, %arg1: i32) -> (i32, i32) {
    %c0_i32 = arith.constant 0 : i32
    %c0_i32_0 = arith.constant 0 : i32
    return %arg0, %c0_i32 : i32, i32
  }
  func.func @transform_2(%arg0: i32, %arg1: i32) -> (i32, i32, i32) {
    %c0_i32 = arith.constant 0 : i32
    %c0_i32_0 = arith.constant 0 : i32
    return %arg1, %arg0, %c0_i32 : i32, i32, i32
  }
  func.func @transform_3(%arg0: i32, %arg1: i32) -> (i32, i32, i32) {
    %c0_i32 = arith.constant 0 : i32
    %c0_i32_0 = arith.constant 0 : i32
    return %arg1, %arg0, %c0_i32 : i32, i32, i32
  }
  func.func @transform_4(%arg0: i32, %arg1: i32) -> (i32, i32, i32, i32) {
    %c0_i32 = arith.constant 0 : i32
    %c0_i32_0 = arith.constant 0 : i32
    %c0_i32_1 = arith.constant 0 : i32
    return %arg0, %arg1, %c0_i32, %c0_i32_0 : i32, i32, i32, i32
  }
}

</mosaic_0001>

<bundles_post_ra>
// kernel: tpu_custom_call.1
= control target key start
LH: loop header
LB: loop body
LE: loop exit
PB: predicated region body
PF: predicated region fallthrough
CT: control target
= control target key end

     0   :  { %s1094_s0 = inlined_call_operand.hbm [shape: f32[16,128], index: 0, kind: input, shape index: {}]   ;;  %s1095_s1 = inlined_call_operand.hbm [shape: f32[16,128], index: 1, kind: input, shape index: {}]   ;;  %s1096_s2 = inlined_call_operand.hbm [shape: f32[4,16,128], index: 2, kind: input, shape index: {}]   ;;  %s1097_s3 = inlined_call_operand.hbm [shape: f32[4,16,128], index: 3, kind: output, shape index: {0}]   ;;  %s1098_s4 = inlined_call_operand.hbm [shape: f32[1,4,1,128], index: 4, kind: output, shape index: {1}]  }
   0x1   :  { %1101 = sst [smem:[#allocation18_spill]] %s1094_s0 }
   0x2   :  { %1102 = sst [smem:[#allocation19_spill]] %s1095_s1 }
   0x3   :  { %10 = vsyncpa [#allocation5], 0 }
   0x4   :  { %11 = vsyncpa [#allocation8], 0 }
   0x5   :  { %12 = vsyncpa [#allocation6], 0 }
   0x6   :  { %14 = vsyncpa [#allocation6 + $0x1], 0 }
   0x7   :  { %15 = vsyncpa [#allocation12], 0 }
   0x8   :  { %17 = vsyncpa [#allocation12 + $0x1], 0  ;;  %s906_s15 = smov 0   ;;  %s908_s16 = smov 0  }
   0x9   :  { %s910_s17 = smov 0   ;;  %s912_s18 = smov 0  }
   0xa   :  { %s914_s19 = smov 0   ;;  %s916_s20 = smov 0  }
   0xb LB: > { %s937_s21 = sadd.s32 4294967295, %s873_s20   ;;  %s540_s22 = sadd.s32 4294967294, %s873_s20   ;;  %s873_s20 = sphi %s916_s20, %s23_s20   ;;  %s869_s19 = sphi %s914_s19, %s1116_s19   ;;  %s865_s18 = sphi %s912_s18, %s1115_s18   ;;  %s861_s17 = sphi %s910_s17, %s1114_s17   ;;  %s857_s16 = sphi %s908_s16, %s1113_s16   ;;  %s853_s15 = sphi %s906_s15, %s1112_s15  }
   0xc   : > { %p109_p0 = scmp.ne.s32.totalorder %s857_s16, %s853_s15  ;;  %p110_p1 = scmp.eq.s32.totalorder %s937_s21, 0 }
   0xd   : > { %p135_p2 = scmp.eq.s32.totalorder %s937_s21, 3  ;;  %p141_p3 = scmp.eq.s32.totalorder %s540_s22, 3 }
   0xe   : > { %p946_p4 = por %p110_p1, %p109_p0  ;;  %p541_p5 = scmp.ge.s32.totalorder %s873_s20, 1 }
   0xf   : > { %p951_p6 = por %p141_p3, %p109_p0  ;;  %p176_p7 = scmp.lt.s32.totalorder %s873_s20, 5 }
  0x10   : > { %s1105_s0 = sld [smem:[#allocation18_spill]]  ;;  %s875_s29 = smov [#allocation4]  }
  0x11   : > { %p959_p8 = pnand %p541_p5, %p176_p7  ;;  %s192_s30 = sshll.u32 %s875_s29, 4  ;;  %s193_s30 = int_to_ptr.vmem [resolvable:$true] %s192_s30 }
  0x12   : > { %s1107_s1 = sld [smem:[#allocation19_spill]]  ;;  %s1099_s8 = smov 128  }
  0x13   : > { %p579_p9 = pneg %p959_p8  ;;  %s1100_s9 = smov 8  }
  0x14   : > { %s878_s10 = smov [#allocation7]   ;;  %s32_s12 = sadd.s32 1, %s869_s19 }
  0x15   : > { %p580_p10 = pnand %p579_p9, %p110_p1  ;;  %s209_s11 = sshll.u32 %s878_s10, 4  ;;  %s210_s11 = int_to_ptr.vmem [resolvable:$true] %s209_s11 }
  0x16   : > { %s190_s27 = sshll.u32 %s1105_s0, 4  ;;  %s96_s13 = sadd.s32 1, %s861_s17  ;;  %s191_s27 = int_to_ptr.hbm [resolvable:$true] %s190_s27 }
  0x17   : > { %582 = dma.hbm_to_vmem [thread:$0]  (!%p580_p10), %s191_s27, 256, %s193_s30, [#allocation5], %s1099_s8, %s1099_s8, %s1100_s9  }
  0x18   : > { %s207_s7 = sshll.u32 %s1107_s1, 4  ;;  %p33_p11 = scmp.ge.s32.totalorder %s32_s12, 4  ;;  %s208_s7 = int_to_ptr.hbm [resolvable:$true] %s207_s7 }
  0x19   : > { %585 = dma.hbm_to_vmem [thread:$0]  (!%p580_p10), %s208_s7, 256, %s210_s11, [#allocation8], %s1099_s8, %s1099_s8, %s1100_s9  }
  0x1a   : > { %p103_p12 = scmp.ne.s32.totalorder %s861_s17, %s857_s16  ;;  %p104_p13 = scmp.eq.s32.totalorder %s873_s20, 0 }
  0x1b   : > { %p599_p0 = scmp.lt.s32.totalorder %s873_s20, 4  ;;  %s1118_s12 = smov (%p33_p11, %s32_s12), 0 }
  0x1c   : > { %p984_p3 = por %p104_p13, %p103_p12  ;;  %p990_p5 = por %p135_p2, %p103_p12 }
  0x1d   : > { %s91_s25 = ssub.s32 %s869_s19, %s1118_s12  ;;  %s223_s26 = sand.u32 1, %s873_s20  }
  0x1e   : > { %p94_p7 = scmp.eq.s32.totalorder %s91_s25, 0  ;;  %s225_s27 = sand.u32 1, %s861_s17  }
  0x1f   : > { %s559_s29 = sshll.u32 %s869_s19, 4  ;;  %s545_s5 = sshll.u32 %s225_s27, 4 }
  0x20   : > { %s1000_s30 = scalar_select %p94_p7, %s861_s17, %s96_s13  }
  0x21   : > { %s234_s10 = scalar_lea.hbm %s1096_s2, %s559_s29  ;;  %s227_s8 = scalar_lea.vmem [#allocation9], %s545_s5 }
  0x22   : > { %s235_s11 = sshll.u32 %s234_s10, 4  ;;  %s237_s9 = sshll.u32 %s227_s8, 4  ;;  %s236_s11 = int_to_ptr.hbm [resolvable:$true] %s235_s11  ;;  %s238_s9 = int_to_ptr.vmem [resolvable:$true] %s237_s9 }
  0x23   : > { %p587_p2 = pnand %p599_p0, %p984_p3  ;;  %s224_s0 = scalar_lea.sflag [#allocation5], %s223_s26 }
  0x24   : > { %s1110_s1 = smov 8   ;;  %s1111_s25 = smov 128  }
  0x25   : > { %589 = dma.hbm_to_vmem [thread:$0]  (!%p587_p2), %s236_s11, 256, %s238_s9, %s224_s0, %s1111_s25, %s1111_s25, %s1110_s1  }
  0x26   : > { %249 = sbr.rel (%p959_p8) target bundleno = 283 (0x11b), region = 32 }
  0x2b   : > { %832 = dma.done.wait (%p110_p1), [#allocation5], 256  }
  0x2c   : > { %834 = vsyncadd (%p110_p1), [#allocation5], 4294967040 }
  0x2d   : > { %836 = dma.done.wait (%p110_p1), [#allocation8], 256  }
  0x2e   : > { %838 = vsyncadd (%p110_p1), [#allocation8], 4294967040  ;;  %s261_s8 = sand.u32 1, %s937_s21   ;;  %s1024_s0 = sand.u32 1, %s857_s16  }
  0x2f   : > { %s551_s1 = sshll.u32 %s1024_s0, 4  ;;  %s262_s28 = scalar_lea.sflag [#allocation5], %s261_s8 }
  0x30   : > { %s265_s9 = scalar_lea.vmem [#allocation9], %s551_s1 }
  0x31   : > { %840 = dma.done.wait (%p946_p4), %s262_s28, 256  }
  0x32   : > { %842 = vsyncadd (%p946_p4), %s262_s28, 4294967040  ;;  %s1031_s13 = scalar_lea.vmem [#allocation10], %s551_s1  ;;  %s294_s14 = scalar_lea.vmem [#allocation11], %s1024_s0 }
  0x33   : > { %p553_p1 = scmp.ne.s32.totalorder %s865_s18, 0 }
  0x35   : > { %302 = sbr.rel (%p553_p1) target bundleno = 74 (0x4a), region = 48 }
  0x3a   : > { %v303_v0 = vld [vmem:[#allocation4] sm:$0xff]  ;;  %v304_v1 = vld [vmem:[#allocation4 + $0x8] sm:$0xff]  ;;  %v309_v2 = vld [vmem:[#allocation7] sm:$0xff] }
  0x3b   : > { %v305_v3 = vmul.f32 0.088388346, %v303_v0  ;;  %v306_v4 = vmul.f32 0.088388346, %v304_v1  ;;  %v311_v5 = vmul.f32 0.5, %v309_v2  ;;  %v310_v6 = vld [vmem:[#allocation7 + $0x8] sm:$0xff] }
  0x3c   : > { %v312_v7 = vmul.f32 0.5, %v310_v6 }
  0x3d   : > { %307 = vst [vmem:[#allocation2] sm:$0xff] %v305_v3  ;;  %v313_v8 = vmul.f32 1.442695, %v311_v5 }
  0x3e   : > { %308 = vst [vmem:[#allocation2 + $0x8] sm:$0xff] %v306_v4  ;;  %v315_v9 = vmul.f32 1.442695, %v312_v7 }
  0x3f   : > { %657 = vpow2.f32 %v313_v8 }
  0x40   : > { %659 = vpow2.f32 %v315_v9 }
  0x45   : > { %v658_v10 = vpop.eup %657 }
  0x46   : > { %v660_v11 = vpop.eup %659  ;;  %v317_v12 = vmul.f32 0.088388346, %v658_v10 }
  0x47   : > { %v318_v13 = vmul.f32 0.088388346, %v660_v11 }
  0x48   : > { %319 = vst [vmem:[#allocation3 + $0x8] sm:$0xff] %v317_v12 }
  0x49   : > { %320 = vst [vmem:[#allocation3] sm:$0xff] %v318_v13 }
  0x4a PF: > { %v321_v14 = vld [vmem:[%s265_s9] sm:$0xff]  ;;  %v322_v15 = vld [vmem:[%s265_s9 + $0x8] sm:$0xff]  ;;  %s560_s21 = sshll.u32 %s865_s18, 4  ;;  %s381_s29 = sshll.u32 %s1031_s13, 4  ;;  %s382_s29 = int_to_ptr.vmem [resolvable:$true] %s381_s29 }
  0x4b   : > { %v323_v16 = vld [vmem:[#allocation2] sm:$0xff]  ;;  %v324_v17 = vld [vmem:[#allocation2 + $0x8] sm:$0xff]  ;;  %v345_v27 = vmul.f32 %v321_v14, %v321_v14  ;;  %v346_v28 = vmul.f32 %v322_v15, %v322_v15  ;;  %s380_s27 = scalar_lea.hbm %s1097_s3, %s560_s21  ;;  %s363_s6 = scalar_lea.sflag [#allocation6], %s1024_s0 }
  0x4c   : > { %s383_s5 = sshll.u32 %s380_s27, 4  ;;  %s771_s8 = scalar_lea.hbm %s1097_s3, 64  ;;  %s384_s5 = int_to_ptr.hbm [resolvable:$true] %s383_s5 }
  0x4d   : > { %v347_v29 = vadd.f32 %v346_v28, %v345_v27  ;;  %s765_s7 = sshra.s32 %s384_s5, 4  ;;  %s766_s7 = int_to_ptr.hbm [resolvable:$true] %s765_s7 }
  0x4e   : > { %s767_s10 = scalar_lea.hbm %s766_s7, 16  ;;  %p772_p10 = scmp.lt.s32.totalorder %s766_s7, %s1097_s3 }
  0x4f   : > { %v325_v18 = vld [vmem:[#allocation3 + $0x8] sm:$0xff]  ;;  %p768_p4 = scmp.ne.s32.totalorder %s766_s7, %s767_s10  ;;  %p773_p11 = scmp.lt.s32.totalorder %s771_s8, %s767_s10 }
  0x50   : > { %v326_v19 = vld [vmem:[#allocation3] sm:$0xff]  ;;  %v327_v20 = vmul.f32 %v325_v18, %v321_v14 }
  0x51   : > { %v328_v21 = vmul.f32 %v326_v19, %v322_v15  ;;  %p769_p8 = pnand %p768_p4, %p990_p5  ;;  %p774_p12 = por %p773_p11, %p772_p10 }
  0x52   : > { %v329_v22 = vadd.f32 %v327_v20, %v323_v16 }
  0x53   : > { %v330_v23 = vadd.f32 %v328_v21, %v324_v17  ;;  %p770_p9 = pneg %p769_p8 }
  0x54   : > { %v333_v24 = vmul.f32 %v329_v22, %v329_v22  ;;  %331 = vst [vmem:[%s1031_s13] sm:$0xff] %v329_v22 }
  0x55   : > { %332 = vst [vmem:[%s1031_s13 + $0x8] sm:$0xff] %v330_v23  ;;  %v334_v25 = vmul.f32 %v330_v23, %v330_v23  ;;  %p775_p13 = pnand %p774_p12, %p770_p9 }
  0x57   : > { %v335_v26 = vadd.f32 %v334_v25, %v333_v24 }
  0x59   : > { %336 = vadd.xlane.f32.xlu0 %v335_v26 }
  0x61   : > { %348 = vadd.xlane.f32.xlu0 %v347_v29 }
  0x62   : > { %778 = shalt.err (!%p775_p13)
}
  0x63   : > { %s879_s9 = smov 128   ;;  %s880_s13 = smov 8  }
  0x64   : > { %575 = dma.vmem_to_hbm [thread:$0]  (%p990_p5), %s382_s29, 256, %s384_s5, %s363_s6, %s879_s9, %s879_s9, %s880_s13  }
  0x65   : > { %s397_s27 = scalar_lea.hbm %s1098_s4, %s865_s18  ;;  %s399_s29 = sshll.u32 %s294_s14, 4  ;;  %s400_s29 = int_to_ptr.vmem [resolvable:$true] %s399_s29 }
  0x66   : > { %s401_s10 = sshll.u32 %s397_s27, 4  ;;  %s368_s25 = scalar_lea.sflag [#allocation12], %s1024_s0  ;;  %s402_s10 = int_to_ptr.hbm [resolvable:$true] %s401_s10 }
  0x67   : > { %s793_s8 = sshra.s32 %s402_s10, 4  ;;  %s799_s9 = scalar_lea.hbm %s1098_s4, 4  ;;  %s794_s8 = int_to_ptr.hbm [resolvable:$true] %s793_s8 }
  0x68   : > { %s795_s1 = scalar_lea.hbm %s794_s8, 1  ;;  %p800_p2 = scmp.lt.s32.totalorder %s794_s8, %s1098_s4 }
  0x69   : > { %p796_p0 = scmp.ne.s32.totalorder %s794_s8, %s795_s1  ;;  %p801_p1 = scmp.lt.s32.totalorder %s799_s9, %s795_s1 }
  0x6b   : > { %p797_p3 = pnand %p796_p0, %p990_p5  ;;  %p802_p4 = por %p801_p1, %p800_p2 }
  0x6d   : > { %p798_p7 = pneg %p797_p3 }
  0x6f   : > { %p803_p8 = pnand %p802_p4, %p798_p7 }
  0xcc   : > { %v337_v30 = vpop.xlane.xlu0 %336 }
  0xcd   : > { %v338_v31 = vrot.slane %v337_v30, 4 }
  0xcf   : > { %v339_v32 = vadd.f32 %v338_v31, %v337_v30 }
  0xd1   : > { %v340_v33 = vrot.slane %v339_v32, 2 }
  0xd3   : > { %v341_v34 = vadd.f32 %v340_v33, %v339_v32 }
  0xd4   : > { %v349_v35 = vpop.xlane.xlu0 %348 }
  0xd5   : > { %v350_v36 = vrot.slane %v349_v35, 4  ;;  %v342_v37 = vrot.slane %v341_v34, 1 }
  0xd7   : > { %v351_v38 = vadd.f32 %v350_v36, %v349_v35  ;;  %v343_v39 = vadd.f32 %v342_v37, %v341_v34 }
  0xd9   : > { %v352_v40 = vrot.slane %v351_v38, 2  ;;  %561 = vpush %v343_v39 }
  0xdb   : > { %v353_v41 = vadd.f32 %v352_v40, %v351_v38 }
  0xdd   : > { %v354_v42 = vrot.slane %v353_v41, 1 }
  0xdf   : > { %v355_v43 = vadd.f32 %v354_v42, %v353_v41 }
  0xe1   : > { %563 = vpush %v355_v43 }
 0x10a   : > { %s562_s21 = spop %561 }
 0x10b   : > { %s357_s5 = smul.f32 -64.0, %s562_s21 }
 0x112   : > { %s564_s6 = spop %563 }
 0x113   : > { %s358_s7 = smul.f32 0.5, %s564_s6 }
 0x115   : > { %s359_s11 = sadd.f32 %s358_s7, %s357_s5 }
 0x117   : > { %v360_v44 = vstv %s359_s11 }
 0x118   : > { %361 = vst [vmem:[%s294_s14] sm:$0x1] %v360_v44 }
 0x119   : > { %806 = shalt.err (!%p803_p8)
}
 0x11a   : > { %576 = dma.vmem_to_hbm [thread:$0]  (%p990_p5), %s400_s29, 16, %s402_s10, %s368_s25  }
 0x11b PF: > { %p602_p9 = scmp.ge.s32.totalorder %s873_s20, 2  ;;  %s413_s0 = sand.u32 1, %s853_s15  }
 0x11c   : > { %s414_s14 = scalar_lea.sflag [#allocation6], %s413_s0 }
 0x11d   : > { %p591_p10 = pnand %p602_p9, %p951_p6 }
 0x11f   : > { %p592_p11 = pneg %p591_p10 }
 0x121   : > { %844 = dma.done.wait (%p592_p11), %s414_s14, 256  }
 0x122   : > { %846 = vsyncadd (%p592_p11), %s414_s14, 4294967040  ;;  %s424_s23 = scalar_lea.sflag [#allocation12], %s413_s0 }
 0x123   : > { %848 = dma.done.wait (%p592_p11), %s424_s23, 16  }
 0x124   : > { %850 = vsyncadd (%p592_p11), %s424_s23, 4294967280  ;;  %s23_s20 = sadd.s32 1, %s873_s20   ;;  %s1112_s15 = smov %s857_s16 }
 0x125   : > { %p20_p12 = scmp.ge.s32.totalorder %s23_s20, 6   ;;  %s1113_s16 = smov %s861_s17 }
 0x126   : > { %s1114_s17 = smov %s1000_s30  ;;  %s1115_s18 = smov %s869_s19 }
 0x127   : > { %s1116_s19 = smov %s1118_s12  ;;  %22 = sbr.rel (!%p20_p12) target bundleno = 11 (0xb), region = 107 }
 0x12c   :  { %429 = vsyncpa [#allocation5], 1 }
 0x12d   :  { %431 = vsyncpa [#allocation5 + $0x1], 1 }
 0x12e   :  { %432 = vsyncpa [#allocation8], 1 }
 0x12f   :  { %433 = vsyncpa [#allocation6], 1 }
 0x130   :  { %435 = vsyncpa [#allocation6 + $0x1], 1 }
 0x131   :  { %436 = vsyncpa [#allocation12], 1 }
 0x132   :  { %438 = vsyncpa [#allocation12 + $0x1], 1 }

</bundles_post_ra>
